<compile_context>
chip_gen: v5e
topology: v5e:2x2
jax: 0.10.0
libtpu: 0.0.40
codegen_flags: <defaults>
</compile_context>

<pallas_src>
import jax
import jax.numpy as jnp
from jax.experimental import pallas as pl
from jax.experimental.pallas import tpu as pltpu

_LANE = 128
_SUBLANE = 8


def _round_up(n, m):
    return ((n + m - 1) // m) * m


def _nlsm_kernel(w1_ref, b1_ref, w3_ref, b3_ref, x_ref, o_ref):
    """x_ref: (F, tr, 128) VMEM tile; weights/biases: flat f32 SMEM refs.

    Computes, per batch element (one (sublane, lane) position):
        h_j = leaky_relu_0.5( b1[j] + sum_f w1[j, f] * x[f] )
        y   = b3 + sum_j w3[j] * h_j
    fully unrolled on the VPU (scalar-from-SMEM times dense (tr,128) slab).
    """
    F = x_ref.shape[0]
    H = b1_ref.shape[0]

    x = x_ref[...]                       # (F, tr, 128), loaded once
    xs = [x[f] for f in range(F)]        # each (tr, 128), dense vregs

    y = None
    for j in range(H):
        h = xs[0] * w1_ref[j * F]
        for f in range(1, F):
            h = h + xs[f] * w1_ref[j * F + f]
        h = h + b1_ref[j]
        # LeakyReLU(0.5):  max(h, 0.5*h) == h if h>=0 else 0.5*h  (slope in (0,1))
        h = jnp.maximum(h, 0.5 * h)
        term = h * w3_ref[j]
        y = term if y is None else y + term
    y = y + b3_ref[0]
    o_ref[...] = y.astype(o_ref.dtype)


def nlsm_forward(x, w1, b1, w3, b3, *, batch_tile=4096):
    """Forward pass of NetworkNLSM.

    x:  (B, F) f32, F = nb_stocks + 1
    w1: (H, F)  layer1.weight   b1: (H,)  layer1.bias
    w3: (H,)    layer3.weight   b3: (1,)  layer3.bias
    returns (B, 1) f32.
    """
    x = x.astype(jnp.float32)
    B, F = x.shape
    H = b1.shape[0]

    # --- choose the batch tile (in batch elements) -------------------------
    b_lanes = _round_up(B, _LANE)                    # batch rounded to lanes
    tile = min(_round_up(int(batch_tile), _LANE), b_lanes)
    if tile < b_lanes:
        # multi-step grid: sublane-row count of the tile must be /8-aligned
        tile = _round_up(tile, _SUBLANE * _LANE)
    Bp = _round_up(b_lanes, tile)                    # padded batch
    tr = tile // _LANE                               # sublane rows per tile
    nrows = Bp // _LANE
    grid = (Bp // tile,)

    # --- layout plumbing: batch onto (sublane, lane) axes ------------------
    # (B, F) -> pad -> (F, Bp) -> (F, nrows, 128).  Pure layout, fused by XLA.
    x_pad = jnp.pad(x, ((0, Bp - B), (0, 0))) if Bp != B else x
    x3 = jnp.transpose(x_pad).reshape(F, nrows, _LANE)

    w1_flat = w1.astype(jnp.float32).reshape(-1)     # (H*F,)  row-major: [j*F+f]
    b1_f = b1.astype(jnp.float32).reshape(-1)        # (H,)
    w3_f = w3.astype(jnp.float32).reshape(-1)        # (H,)
    b3_f = b3.astype(jnp.float32).reshape(-1)        # (1,)

    smem_spec = pl.BlockSpec(memory_space=pltpu.MemorySpace.SMEM)

    out = pl.pallas_call(
        _nlsm_kernel,
        out_shape=jax.ShapeDtypeStruct((nrows, _LANE), jnp.float32),
        grid_spec=pltpu.PrefetchScalarGridSpec(
            num_scalar_prefetch=0,
            grid=grid,
            in_specs=[
                smem_spec,                                    # w1 (flat)
                smem_spec,                                    # b1
                smem_spec,                                    # w3
                smem_spec,                                    # b3
                pl.BlockSpec((F, tr, _LANE), lambda i: (0, i, 0)),  # x tile
            ],
            out_specs=pl.BlockSpec((tr, _LANE), lambda i: (i, 0)),
        ),
        compiler_params=pltpu.CompilerParams(
            dimension_semantics=("parallel",)),
    )(w1_flat, b1_f, w3_f, b3_f, x3)

    # lane-dense (nrows, 128) slab -> (B, 1)
    return out.reshape(-1)[:B].reshape(B, 1)


def init_params(key, nb_stocks, hidden_size=10):
    """Deterministic synthetic init with PyTorch nn.Linear shapes."""
    F = nb_stocks + 1
    H = hidden_size
    k1, k2, k3, k4 = jax.random.split(key, 4)
    lim1 = 1.0 / jnp.sqrt(jnp.float32(F))
    lim3 = 1.0 / jnp.sqrt(jnp.float32(H))
    w1 = jax.random.uniform(k1, (H, F), jnp.float32, -lim1, lim1)   # layer1.weight
    b1 = jax.random.uniform(k2, (H,), jnp.float32, -lim1, lim1)     # layer1.bias
    w3 = jax.random.uniform(k3, (H,), jnp.float32, -lim3, lim3)     # layer3.weight (1,H) squeezed
    b3 = jax.random.uniform(k4, (1,), jnp.float32, -lim3, lim3)     # layer3.bias
    return w1, b1, w3, b3


def nlsm_reference(x, w1, b1, w3, b3):
    h = x @ w1.T + b1
    h = jnp.where(h >= 0.0, h, 0.5 * h)
    return h @ w3[:, None] + b3


if __name__ == "__main__":
    nb_stocks = 4          # -> input features F = 5
    hidden_size = 10
    batch = 8

    key = jax.random.PRNGKey(0)
    kx, kp = jax.random.split(key)
    x = jax.random.normal(kx, (batch, nb_stocks + 1), jnp.float32)
    params = init_params(kp, nb_stocks, hidden_size)

    fwd = jax.jit(nlsm_forward)
    y = fwd(x, *params)
    jax.block_until_ready(y)

    y_ref = nlsm_reference(x, *params)
    assert y.shape == (batch, 1)
    assert jnp.allclose(y, y_ref, atol=1e-5, rtol=1e-5)
    print("KERNEL_OK")
</pallas_src>

<mosaic_0001>
module attributes {stable_mosaic.version = 11 : i64} {
  func.func @_nlsm_kernel(%arg0: i32, %arg1: memref<50xf32, #tpu.memory_space<smem>>, %arg2: memref<10xf32, #tpu.memory_space<smem>>, %arg3: memref<10xf32, #tpu.memory_space<smem>>, %arg4: memref<1xf32, #tpu.memory_space<smem>>, %arg5: memref<5x1x128xf32, #tpu.memory_space<vmem>>, %arg6: memref<1x128xf32, #tpu.memory_space<vmem>>) attributes {dimension_semantics = [#tpu.dimension_semantics<parallel>], iteration_bounds = array<i64: 1>, scalar_prefetch = 0 : i64, scratch_operands = 0 : i64, tpu.core_type = #tpu.core_type<tc>, window_params = [{transform_indices = @transform_0, window_bounds = array<i64: 50>}, {transform_indices = @transform_1, window_bounds = array<i64: 10>}, {transform_indices = @transform_2, window_bounds = array<i64: 10>}, {transform_indices = @transform_3, window_bounds = array<i64: 1>}, {transform_indices = @transform_4, window_bounds = array<i64: 5, 1, 128>}, {transform_indices = @transform_5, window_bounds = array<i64: 1, 128>}]} {
    %c0 = arith.constant 0 : index
    %c0_0 = arith.constant 0 : index
    %c0_1 = arith.constant 0 : index
    %0 = vector.load %arg5[%c0, %c0_0, %c0_1] : memref<5x1x128xf32, #tpu.memory_space<vmem>>, vector<5x1x128xf32>
    %1 = vector.extract_strided_slice %0 {offsets = [0, 0, 0], sizes = [1, 1, 128], strides = [1, 1, 1]} : vector<5x1x128xf32> to vector<1x1x128xf32>
    %2 = vector.shape_cast %1 : vector<1x1x128xf32> to vector<1x128xf32>
    %3 = vector.extract_strided_slice %0 {offsets = [1, 0, 0], sizes = [1, 1, 128], strides = [1, 1, 1]} : vector<5x1x128xf32> to vector<1x1x128xf32>
    %4 = vector.shape_cast %3 : vector<1x1x128xf32> to vector<1x128xf32>
    %5 = vector.extract_strided_slice %0 {offsets = [2, 0, 0], sizes = [1, 1, 128], strides = [1, 1, 1]} : vector<5x1x128xf32> to vector<1x1x128xf32>
    %6 = vector.shape_cast %5 : vector<1x1x128xf32> to vector<1x128xf32>
    %7 = vector.extract_strided_slice %0 {offsets = [3, 0, 0], sizes = [1, 1, 128], strides = [1, 1, 1]} : vector<5x1x128xf32> to vector<1x1x128xf32>
    %8 = vector.shape_cast %7 : vector<1x1x128xf32> to vector<1x128xf32>
    %9 = vector.extract_strided_slice %0 {offsets = [4, 0, 0], sizes = [1, 1, 128], strides = [1, 1, 1]} : vector<5x1x128xf32> to vector<1x1x128xf32>
    %10 = vector.shape_cast %9 : vector<1x1x128xf32> to vector<1x128xf32>
    %c0_2 = arith.constant 0 : index
    %11 = memref.load %arg1[%c0_2] : memref<50xf32, #tpu.memory_space<smem>>
    %12 = vector.broadcast %11 : f32 to vector<1x128xf32>
    %13 = arith.mulf %2, %12 : vector<1x128xf32>
    %c1 = arith.constant 1 : index
    %14 = memref.load %arg1[%c1] : memref<50xf32, #tpu.memory_space<smem>>
    %15 = vector.broadcast %14 : f32 to vector<1x128xf32>
    %16 = arith.mulf %4, %15 : vector<1x128xf32>
    %17 = arith.addf %13, %16 : vector<1x128xf32>
    %c2 = arith.constant 2 : index
    %18 = memref.load %arg1[%c2] : memref<50xf32, #tpu.memory_space<smem>>
    %19 = vector.broadcast %18 : f32 to vector<1x128xf32>
    %20 = arith.mulf %6, %19 : vector<1x128xf32>
    %21 = arith.addf %17, %20 : vector<1x128xf32>
    %c3 = arith.constant 3 : index
    %22 = memref.load %arg1[%c3] : memref<50xf32, #tpu.memory_space<smem>>
    %23 = vector.broadcast %22 : f32 to vector<1x128xf32>
    %24 = arith.mulf %8, %23 : vector<1x128xf32>
    %25 = arith.addf %21, %24 : vector<1x128xf32>
    %c4 = arith.constant 4 : index
    %26 = memref.load %arg1[%c4] : memref<50xf32, #tpu.memory_space<smem>>
    %27 = vector.broadcast %26 : f32 to vector<1x128xf32>
    %28 = arith.mulf %10, %27 : vector<1x128xf32>
    %29 = arith.addf %25, %28 : vector<1x128xf32>
    %c0_3 = arith.constant 0 : index
    %30 = memref.load %arg2[%c0_3] : memref<10xf32, #tpu.memory_space<smem>>
    %31 = vector.broadcast %30 : f32 to vector<1x128xf32>
    %32 = arith.addf %29, %31 : vector<1x128xf32>
    %cst = arith.constant 5.000000e-01 : f32
    %33 = vector.broadcast %cst : f32 to vector<1x128xf32>
    %34 = arith.mulf %33, %32 : vector<1x128xf32>
    %35 = arith.maximumf %32, %34 : vector<1x128xf32>
    %c0_4 = arith.constant 0 : index
    %36 = memref.load %arg3[%c0_4] : memref<10xf32, #tpu.memory_space<smem>>
    %37 = vector.broadcast %36 : f32 to vector<1x128xf32>
    %38 = arith.mulf %35, %37 : vector<1x128xf32>
    %c5 = arith.constant 5 : index
    %39 = memref.load %arg1[%c5] : memref<50xf32, #tpu.memory_space<smem>>
    %40 = vector.broadcast %39 : f32 to vector<1x128xf32>
    %41 = arith.mulf %2, %40 : vector<1x128xf32>
    %c6 = arith.constant 6 : index
    %42 = memref.load %arg1[%c6] : memref<50xf32, #tpu.memory_space<smem>>
    %43 = vector.broadcast %42 : f32 to vector<1x128xf32>
    %44 = arith.mulf %4, %43 : vector<1x128xf32>
    %45 = arith.addf %41, %44 : vector<1x128xf32>
    %c7 = arith.constant 7 : index
    %46 = memref.load %arg1[%c7] : memref<50xf32, #tpu.memory_space<smem>>
    %47 = vector.broadcast %46 : f32 to vector<1x128xf32>
    %48 = arith.mulf %6, %47 : vector<1x128xf32>
    %49 = arith.addf %45, %48 : vector<1x128xf32>
    %c8 = arith.constant 8 : index
    %50 = memref.load %arg1[%c8] : memref<50xf32, #tpu.memory_space<smem>>
    %51 = vector.broadcast %50 : f32 to vector<1x128xf32>
    %52 = arith.mulf %8, %51 : vector<1x128xf32>
    %53 = arith.addf %49, %52 : vector<1x128xf32>
    %c9 = arith.constant 9 : index
    %54 = memref.load %arg1[%c9] : memref<50xf32, #tpu.memory_space<smem>>
    %55 = vector.broadcast %54 : f32 to vector<1x128xf32>
    %56 = arith.mulf %10, %55 : vector<1x128xf32>
    %57 = arith.addf %53, %56 : vector<1x128xf32>
    %c1_5 = arith.constant 1 : index
    %58 = memref.load %arg2[%c1_5] : memref<10xf32, #tpu.memory_space<smem>>
    %59 = vector.broadcast %58 : f32 to vector<1x128xf32>
    %60 = arith.addf %57, %59 : vector<1x128xf32>
    %cst_6 = arith.constant 5.000000e-01 : f32
    %61 = vector.broadcast %cst_6 : f32 to vector<1x128xf32>
    %62 = arith.mulf %61, %60 : vector<1x128xf32>
    %63 = arith.maximumf %60, %62 : vector<1x128xf32>
    %c1_7 = arith.constant 1 : index
    %64 = memref.load %arg3[%c1_7] : memref<10xf32, #tpu.memory_space<smem>>
    %65 = vector.broadcast %64 : f32 to vector<1x128xf32>
    %66 = arith.mulf %63, %65 : vector<1x128xf32>
    %67 = arith.addf %38, %66 : vector<1x128xf32>
    %c10 = arith.constant 10 : index
    %68 = memref.load %arg1[%c10] : memref<50xf32, #tpu.memory_space<smem>>
    %69 = vector.broadcast %68 : f32 to vector<1x128xf32>
    %70 = arith.mulf %2, %69 : vector<1x128xf32>
    %c11 = arith.constant 11 : index
    %71 = memref.load %arg1[%c11] : memref<50xf32, #tpu.memory_space<smem>>
    %72 = vector.broadcast %71 : f32 to vector<1x128xf32>
    %73 = arith.mulf %4, %72 : vector<1x128xf32>
    %74 = arith.addf %70, %73 : vector<1x128xf32>
    %c12 = arith.constant 12 : index
    %75 = memref.load %arg1[%c12] : memref<50xf32, #tpu.memory_space<smem>>
    %76 = vector.broadcast %75 : f32 to vector<1x128xf32>
    %77 = arith.mulf %6, %76 : vector<1x128xf32>
    %78 = arith.addf %74, %77 : vector<1x128xf32>
    %c13 = arith.constant 13 : index
    %79 = memref.load %arg1[%c13] : memref<50xf32, #tpu.memory_space<smem>>
    %80 = vector.broadcast %79 : f32 to vector<1x128xf32>
    %81 = arith.mulf %8, %80 : vector<1x128xf32>
    %82 = arith.addf %78, %81 : vector<1x128xf32>
    %c14 = arith.constant 14 : index
    %83 = memref.load %arg1[%c14] : memref<50xf32, #tpu.memory_space<smem>>
    %84 = vector.broadcast %83 : f32 to vector<1x128xf32>
    %85 = arith.mulf %10, %84 : vector<1x128xf32>
    %86 = arith.addf %82, %85 : vector<1x128xf32>
    %c2_8 = arith.constant 2 : index
    %87 = memref.load %arg2[%c2_8] : memref<10xf32, #tpu.memory_space<smem>>
    %88 = vector.broadcast %87 : f32 to vector<1x128xf32>
    %89 = arith.addf %86, %88 : vector<1x128xf32>
    %cst_9 = arith.constant 5.000000e-01 : f32
    %90 = vector.broadcast %cst_9 : f32 to vector<1x128xf32>
    %91 = arith.mulf %90, %89 : vector<1x128xf32>
    %92 = arith.maximumf %89, %91 : vector<1x128xf32>
    %c2_10 = arith.constant 2 : index
    %93 = memref.load %arg3[%c2_10] : memref<10xf32, #tpu.memory_space<smem>>
    %94 = vector.broadcast %93 : f32 to vector<1x128xf32>
    %95 = arith.mulf %92, %94 : vector<1x128xf32>
    %96 = arith.addf %67, %95 : vector<1x128xf32>
    %c15 = arith.constant 15 : index
    %97 = memref.load %arg1[%c15] : memref<50xf32, #tpu.memory_space<smem>>
    %98 = vector.broadcast %97 : f32 to vector<1x128xf32>
    %99 = arith.mulf %2, %98 : vector<1x128xf32>
    %c16 = arith.constant 16 : index
    %100 = memref.load %arg1[%c16] : memref<50xf32, #tpu.memory_space<smem>>
    %101 = vector.broadcast %100 : f32 to vector<1x128xf32>
    %102 = arith.mulf %4, %101 : vector<1x128xf32>
    %103 = arith.addf %99, %102 : vector<1x128xf32>
    %c17 = arith.constant 17 : index
    %104 = memref.load %arg1[%c17] : memref<50xf32, #tpu.memory_space<smem>>
    %105 = vector.broadcast %104 : f32 to vector<1x128xf32>
    %106 = arith.mulf %6, %105 : vector<1x128xf32>
    %107 = arith.addf %103, %106 : vector<1x128xf32>
    %c18 = arith.constant 18 : index
    %108 = memref.load %arg1[%c18] : memref<50xf32, #tpu.memory_space<smem>>
    %109 = vector.broadcast %108 : f32 to vector<1x128xf32>
    %110 = arith.mulf %8, %109 : vector<1x128xf32>
    %111 = arith.addf %107, %110 : vector<1x128xf32>
    %c19 = arith.constant 19 : index
    %112 = memref.load %arg1[%c19] : memref<50xf32, #tpu.memory_space<smem>>
    %113 = vector.broadcast %112 : f32 to vector<1x128xf32>
    %114 = arith.mulf %10, %113 : vector<1x128xf32>
    %115 = arith.addf %111, %114 : vector<1x128xf32>
    %c3_11 = arith.constant 3 : index
    %116 = memref.load %arg2[%c3_11] : memref<10xf32, #tpu.memory_space<smem>>
    %117 = vector.broadcast %116 : f32 to vector<1x128xf32>
    %118 = arith.addf %115, %117 : vector<1x128xf32>
    %cst_12 = arith.constant 5.000000e-01 : f32
    %119 = vector.broadcast %cst_12 : f32 to vector<1x128xf32>
    %120 = arith.mulf %119, %118 : vector<1x128xf32>
    %121 = arith.maximumf %118, %120 : vector<1x128xf32>
    %c3_13 = arith.constant 3 : index
    %122 = memref.load %arg3[%c3_13] : memref<10xf32, #tpu.memory_space<smem>>
    %123 = vector.broadcast %122 : f32 to vector<1x128xf32>
    %124 = arith.mulf %121, %123 : vector<1x128xf32>
    %125 = arith.addf %96, %124 : vector<1x128xf32>
    %c20 = arith.constant 20 : index
    %126 = memref.load %arg1[%c20] : memref<50xf32, #tpu.memory_space<smem>>
    %127 = vector.broadcast %126 : f32 to vector<1x128xf32>
    %128 = arith.mulf %2, %127 : vector<1x128xf32>
    %c21 = arith.constant 21 : index
    %129 = memref.load %arg1[%c21] : memref<50xf32, #tpu.memory_space<smem>>
    %130 = vector.broadcast %129 : f32 to vector<1x128xf32>
    %131 = arith.mulf %4, %130 : vector<1x128xf32>
    %132 = arith.addf %128, %131 : vector<1x128xf32>
    %c22 = arith.constant 22 : index
    %133 = memref.load %arg1[%c22] : memref<50xf32, #tpu.memory_space<smem>>
    %134 = vector.broadcast %133 : f32 to vector<1x128xf32>
    %135 = arith.mulf %6, %134 : vector<1x128xf32>
    %136 = arith.addf %132, %135 : vector<1x128xf32>
    %c23 = arith.constant 23 : index
    %137 = memref.load %arg1[%c23] : memref<50xf32, #tpu.memory_space<smem>>
    %138 = vector.broadcast %137 : f32 to vector<1x128xf32>
    %139 = arith.mulf %8, %138 : vector<1x128xf32>
    %140 = arith.addf %136, %139 : vector<1x128xf32>
    %c24 = arith.constant 24 : index
    %141 = memref.load %arg1[%c24] : memref<50xf32, #tpu.memory_space<smem>>
    %142 = vector.broadcast %141 : f32 to vector<1x128xf32>
    %143 = arith.mulf %10, %142 : vector<1x128xf32>
    %144 = arith.addf %140, %143 : vector<1x128xf32>
    %c4_14 = arith.constant 4 : index
    %145 = memref.load %arg2[%c4_14] : memref<10xf32, #tpu.memory_space<smem>>
    %146 = vector.broadcast %145 : f32 to vector<1x128xf32>
    %147 = arith.addf %144, %146 : vector<1x128xf32>
    %cst_15 = arith.constant 5.000000e-01 : f32
    %148 = vector.broadcast %cst_15 : f32 to vector<1x128xf32>
    %149 = arith.mulf %148, %147 : vector<1x128xf32>
    %150 = arith.maximumf %147, %149 : vector<1x128xf32>
    %c4_16 = arith.constant 4 : index
    %151 = memref.load %arg3[%c4_16] : memref<10xf32, #tpu.memory_space<smem>>
    %152 = vector.broadcast %151 : f32 to vector<1x128xf32>
    %153 = arith.mulf %150, %152 : vector<1x128xf32>
    %154 = arith.addf %125, %153 : vector<1x128xf32>
    %c25 = arith.constant 25 : index
    %155 = memref.load %arg1[%c25] : memref<50xf32, #tpu.memory_space<smem>>
    %156 = vector.broadcast %155 : f32 to vector<1x128xf32>
    %157 = arith.mulf %2, %156 : vector<1x128xf32>
    %c26 = arith.constant 26 : index
    %158 = memref.load %arg1[%c26] : memref<50xf32, #tpu.memory_space<smem>>
    %159 = vector.broadcast %158 : f32 to vector<1x128xf32>
    %160 = arith.mulf %4, %159 : vector<1x128xf32>
    %161 = arith.addf %157, %160 : vector<1x128xf32>
    %c27 = arith.constant 27 : index
    %162 = memref.load %arg1[%c27] : memref<50xf32, #tpu.memory_space<smem>>
    %163 = vector.broadcast %162 : f32 to vector<1x128xf32>
    %164 = arith.mulf %6, %163 : vector<1x128xf32>
    %165 = arith.addf %161, %164 : vector<1x128xf32>
    %c28 = arith.constant 28 : index
    %166 = memref.load %arg1[%c28] : memref<50xf32, #tpu.memory_space<smem>>
    %167 = vector.broadcast %166 : f32 to vector<1x128xf32>
    %168 = arith.mulf %8, %167 : vector<1x128xf32>
    %169 = arith.addf %165, %168 : vector<1x128xf32>
    %c29 = arith.constant 29 : index
    %170 = memref.load %arg1[%c29] : memref<50xf32, #tpu.memory_space<smem>>
    %171 = vector.broadcast %170 : f32 to vector<1x128xf32>
    %172 = arith.mulf %10, %171 : vector<1x128xf32>
    %173 = arith.addf %169, %172 : vector<1x128xf32>
    %c5_17 = arith.constant 5 : index
    %174 = memref.load %arg2[%c5_17] : memref<10xf32, #tpu.memory_space<smem>>
    %175 = vector.broadcast %174 : f32 to vector<1x128xf32>
    %176 = arith.addf %173, %175 : vector<1x128xf32>
    %cst_18 = arith.constant 5.000000e-01 : f32
    %177 = vector.broadcast %cst_18 : f32 to vector<1x128xf32>
    %178 = arith.mulf %177, %176 : vector<1x128xf32>
    %179 = arith.maximumf %176, %178 : vector<1x128xf32>
    %c5_19 = arith.constant 5 : index
    %180 = memref.load %arg3[%c5_19] : memref<10xf32, #tpu.memory_space<smem>>
    %181 = vector.broadcast %180 : f32 to vector<1x128xf32>
    %182 = arith.mulf %179, %181 : vector<1x128xf32>
    %183 = arith.addf %154, %182 : vector<1x128xf32>
    %c30 = arith.constant 30 : index
    %184 = memref.load %arg1[%c30] : memref<50xf32, #tpu.memory_space<smem>>
    %185 = vector.broadcast %184 : f32 to vector<1x128xf32>
    %186 = arith.mulf %2, %185 : vector<1x128xf32>
    %c31 = arith.constant 31 : index
    %187 = memref.load %arg1[%c31] : memref<50xf32, #tpu.memory_space<smem>>
    %188 = vector.broadcast %187 : f32 to vector<1x128xf32>
    %189 = arith.mulf %4, %188 : vector<1x128xf32>
    %190 = arith.addf %186, %189 : vector<1x128xf32>
    %c32 = arith.constant 32 : index
    %191 = memref.load %arg1[%c32] : memref<50xf32, #tpu.memory_space<smem>>
    %192 = vector.broadcast %191 : f32 to vector<1x128xf32>
    %193 = arith.mulf %6, %192 : vector<1x128xf32>
    %194 = arith.addf %190, %193 : vector<1x128xf32>
    %c33 = arith.constant 33 : index
    %195 = memref.load %arg1[%c33] : memref<50xf32, #tpu.memory_space<smem>>
    %196 = vector.broadcast %195 : f32 to vector<1x128xf32>
    %197 = arith.mulf %8, %196 : vector<1x128xf32>
    %198 = arith.addf %194, %197 : vector<1x128xf32>
    %c34 = arith.constant 34 : index
    %199 = memref.load %arg1[%c34] : memref<50xf32, #tpu.memory_space<smem>>
    %200 = vector.broadcast %199 : f32 to vector<1x128xf32>
    %201 = arith.mulf %10, %200 : vector<1x128xf32>
    %202 = arith.addf %198, %201 : vector<1x128xf32>
    %c6_20 = arith.constant 6 : index
    %203 = memref.load %arg2[%c6_20] : memref<10xf32, #tpu.memory_space<smem>>
    %204 = vector.broadcast %203 : f32 to vector<1x128xf32>
    %205 = arith.addf %202, %204 : vector<1x128xf32>
    %cst_21 = arith.constant 5.000000e-01 : f32
    %206 = vector.broadcast %cst_21 : f32 to vector<1x128xf32>
    %207 = arith.mulf %206, %205 : vector<1x128xf32>
    %208 = arith.maximumf %205, %207 : vector<1x128xf32>
    %c6_22 = arith.constant 6 : index
    %209 = memref.load %arg3[%c6_22] : memref<10xf32, #tpu.memory_space<smem>>
    %210 = vector.broadcast %209 : f32 to vector<1x128xf32>
    %211 = arith.mulf %208, %210 : vector<1x128xf32>
    %212 = arith.addf %183, %211 : vector<1x128xf32>
    %c35 = arith.constant 35 : index
    %213 = memref.load %arg1[%c35] : memref<50xf32, #tpu.memory_space<smem>>
    %214 = vector.broadcast %213 : f32 to vector<1x128xf32>
    %215 = arith.mulf %2, %214 : vector<1x128xf32>
    %c36 = arith.constant 36 : index
    %216 = memref.load %arg1[%c36] : memref<50xf32, #tpu.memory_space<smem>>
    %217 = vector.broadcast %216 : f32 to vector<1x128xf32>
    %218 = arith.mulf %4, %217 : vector<1x128xf32>
    %219 = arith.addf %215, %218 : vector<1x128xf32>
    %c37 = arith.constant 37 : index
    %220 = memref.load %arg1[%c37] : memref<50xf32, #tpu.memory_space<smem>>
    %221 = vector.broadcast %220 : f32 to vector<1x128xf32>
    %222 = arith.mulf %6, %221 : vector<1x128xf32>
    %223 = arith.addf %219, %222 : vector<1x128xf32>
    %c38 = arith.constant 38 : index
    %224 = memref.load %arg1[%c38] : memref<50xf32, #tpu.memory_space<smem>>
    %225 = vector.broadcast %224 : f32 to vector<1x128xf32>
    %226 = arith.mulf %8, %225 : vector<1x128xf32>
    %227 = arith.addf %223, %226 : vector<1x128xf32>
    %c39 = arith.constant 39 : index
    %228 = memref.load %arg1[%c39] : memref<50xf32, #tpu.memory_space<smem>>
    %229 = vector.broadcast %228 : f32 to vector<1x128xf32>
    %230 = arith.mulf %10, %229 : vector<1x128xf32>
    %231 = arith.addf %227, %230 : vector<1x128xf32>
    %c7_23 = arith.constant 7 : index
    %232 = memref.load %arg2[%c7_23] : memref<10xf32, #tpu.memory_space<smem>>
    %233 = vector.broadcast %232 : f32 to vector<1x128xf32>
    %234 = arith.addf %231, %233 : vector<1x128xf32>
    %cst_24 = arith.constant 5.000000e-01 : f32
    %235 = vector.broadcast %cst_24 : f32 to vector<1x128xf32>
    %236 = arith.mulf %235, %234 : vector<1x128xf32>
    %237 = arith.maximumf %234, %236 : vector<1x128xf32>
    %c7_25 = arith.constant 7 : index
    %238 = memref.load %arg3[%c7_25] : memref<10xf32, #tpu.memory_space<smem>>
    %239 = vector.broadcast %238 : f32 to vector<1x128xf32>
    %240 = arith.mulf %237, %239 : vector<1x128xf32>
    %241 = arith.addf %212, %240 : vector<1x128xf32>
    %c40 = arith.constant 40 : index
    %242 = memref.load %arg1[%c40] : memref<50xf32, #tpu.memory_space<smem>>
    %243 = vector.broadcast %242 : f32 to vector<1x128xf32>
    %244 = arith.mulf %2, %243 : vector<1x128xf32>
    %c41 = arith.constant 41 : index
    %245 = memref.load %arg1[%c41] : memref<50xf32, #tpu.memory_space<smem>>
    %246 = vector.broadcast %245 : f32 to vector<1x128xf32>
    %247 = arith.mulf %4, %246 : vector<1x128xf32>
    %248 = arith.addf %244, %247 : vector<1x128xf32>
    %c42 = arith.constant 42 : index
    %249 = memref.load %arg1[%c42] : memref<50xf32, #tpu.memory_space<smem>>
    %250 = vector.broadcast %249 : f32 to vector<1x128xf32>
    %251 = arith.mulf %6, %250 : vector<1x128xf32>
    %252 = arith.addf %248, %251 : vector<1x128xf32>
    %c43 = arith.constant 43 : index
    %253 = memref.load %arg1[%c43] : memref<50xf32, #tpu.memory_space<smem>>
    %254 = vector.broadcast %253 : f32 to vector<1x128xf32>
    %255 = arith.mulf %8, %254 : vector<1x128xf32>
    %256 = arith.addf %252, %255 : vector<1x128xf32>
    %c44 = arith.constant 44 : index
    %257 = memref.load %arg1[%c44] : memref<50xf32, #tpu.memory_space<smem>>
    %258 = vector.broadcast %257 : f32 to vector<1x128xf32>
    %259 = arith.mulf %10, %258 : vector<1x128xf32>
    %260 = arith.addf %256, %259 : vector<1x128xf32>
    %c8_26 = arith.constant 8 : index
    %261 = memref.load %arg2[%c8_26] : memref<10xf32, #tpu.memory_space<smem>>
    %262 = vector.broadcast %261 : f32 to vector<1x128xf32>
    %263 = arith.addf %260, %262 : vector<1x128xf32>
    %cst_27 = arith.constant 5.000000e-01 : f32
    %264 = vector.broadcast %cst_27 : f32 to vector<1x128xf32>
    %265 = arith.mulf %264, %263 : vector<1x128xf32>
    %266 = arith.maximumf %263, %265 : vector<1x128xf32>
    %c8_28 = arith.constant 8 : index
    %267 = memref.load %arg3[%c8_28] : memref<10xf32, #tpu.memory_space<smem>>
    %268 = vector.broadcast %267 : f32 to vector<1x128xf32>
    %269 = arith.mulf %266, %268 : vector<1x128xf32>
    %270 = arith.addf %241, %269 : vector<1x128xf32>
    %c45 = arith.constant 45 : index
    %271 = memref.load %arg1[%c45] : memref<50xf32, #tpu.memory_space<smem>>
    %272 = vector.broadcast %271 : f32 to vector<1x128xf32>
    %273 = arith.mulf %2, %272 : vector<1x128xf32>
    %c46 = arith.constant 46 : index
    %274 = memref.load %arg1[%c46] : memref<50xf32, #tpu.memory_space<smem>>
    %275 = vector.broadcast %274 : f32 to vector<1x128xf32>
    %276 = arith.mulf %4, %275 : vector<1x128xf32>
    %277 = arith.addf %273, %276 : vector<1x128xf32>
    %c47 = arith.constant 47 : index
    %278 = memref.load %arg1[%c47] : memref<50xf32, #tpu.memory_space<smem>>
    %279 = vector.broadcast %278 : f32 to vector<1x128xf32>
    %280 = arith.mulf %6, %279 : vector<1x128xf32>
    %281 = arith.addf %277, %280 : vector<1x128xf32>
    %c48 = arith.constant 48 : index
    %282 = memref.load %arg1[%c48] : memref<50xf32, #tpu.memory_space<smem>>
    %283 = vector.broadcast %282 : f32 to vector<1x128xf32>
    %284 = arith.mulf %8, %283 : vector<1x128xf32>
    %285 = arith.addf %281, %284 : vector<1x128xf32>
    %c49 = arith.constant 49 : index
    %286 = memref.load %arg1[%c49] : memref<50xf32, #tpu.memory_space<smem>>
    %287 = vector.broadcast %286 : f32 to vector<1x128xf32>
    %288 = arith.mulf %10, %287 : vector<1x128xf32>
    %289 = arith.addf %285, %288 : vector<1x128xf32>
    %c9_29 = arith.constant 9 : index
    %290 = memref.load %arg2[%c9_29] : memref<10xf32, #tpu.memory_space<smem>>
    %291 = vector.broadcast %290 : f32 to vector<1x128xf32>
    %292 = arith.addf %289, %291 : vector<1x128xf32>
    %cst_30 = arith.constant 5.000000e-01 : f32
    %293 = vector.broadcast %cst_30 : f32 to vector<1x128xf32>
    %294 = arith.mulf %293, %292 : vector<1x128xf32>
    %295 = arith.maximumf %292, %294 : vector<1x128xf32>
    %c9_31 = arith.constant 9 : index
    %296 = memref.load %arg3[%c9_31] : memref<10xf32, #tpu.memory_space<smem>>
    %297 = vector.broadcast %296 : f32 to vector<1x128xf32>
    %298 = arith.mulf %295, %297 : vector<1x128xf32>
    %299 = arith.addf %270, %298 : vector<1x128xf32>
    %c0_32 = arith.constant 0 : index
    %300 = memref.load %arg4[%c0_32] : memref<1xf32, #tpu.memory_space<smem>>
    %301 = vector.broadcast %300 : f32 to vector<1x128xf32>
    %302 = arith.addf %299, %301 : vector<1x128xf32>
    %c0_33 = arith.constant 0 : index
    %c0_34 = arith.constant 0 : index
    %303 = vector.load %arg6[%c0_33, %c0_34] : memref<1x128xf32, #tpu.memory_space<vmem>>, vector<1x128xf32>
    tpu.vector_store %arg6[%c0_33, %c0_34], %302 {strides = array<i32>} : memref<1x128xf32, #tpu.memory_space<vmem>>, vector<1x128xf32>,
    return
  }
  func.func @transform_0(%arg0: i32) -> i32 {
    %c0_i32 = arith.constant 0 : i32
    %c0_i32_0 = arith.constant 0 : i32
    return %c0_i32 : i32
  }
  func.func @transform_1(%arg0: i32) -> i32 {
    %c0_i32 = arith.constant 0 : i32
    %c0_i32_0 = arith.constant 0 : i32
    return %c0_i32 : i32
  }
  func.func @transform_2(%arg0: i32) -> i32 {
    %c0_i32 = arith.constant 0 : i32
    %c0_i32_0 = arith.constant 0 : i32
    return %c0_i32 : i32
  }
  func.func @transform_3(%arg0: i32) -> i32 {
    %c0_i32 = arith.constant 0 : i32
    %c0_i32_0 = arith.constant 0 : i32
    return %c0_i32 : i32
  }
  func.func @transform_4(%arg0: i32) -> (i32, i32, i32) {
    %c0_i32 = arith.constant 0 : i32
    %c0_i32_0 = arith.constant 0 : i32
    %c0_i32_1 = arith.constant 0 : i32
    return %c0_i32, %arg0, %c0_i32_0 : i32, i32, i32
  }
  func.func @transform_5(%arg0: i32) -> (i32, i32) {
    %c0_i32 = arith.constant 0 : i32
    %c0_i32_0 = arith.constant 0 : i32
    return %arg0, %c0_i32 : i32, i32
  }
}

</mosaic_0001>

<bundles_post_ra>
// kernel: nlsm_forward.1
= control target key start
LH: loop header
LB: loop body
LE: loop exit
PB: predicated region body
PF: predicated region fallthrough
CT: control target
= control target key end

     0   :  { %11 = vsyncpa [#allocation4], 0  ;;  %s674_s0 = inlined_call_operand.vmem [shape: f32[50], index: 0, kind: input, shape index: {}]   ;;  %s675_s1 = inlined_call_operand.vmem [shape: f32[10], index: 1, kind: input, shape index: {}]   ;;  %s676_s2 = inlined_call_operand.vmem [shape: f32[10], index: 2, kind: input, shape index: {}]   ;;  %s677_s3 = inlined_call_operand.<no memory space> [shape: f32[1], index: 3, kind: input, shape index: {}]   ;;  %s678_s4 = inlined_call_operand.vmem [shape: f32[5,1,128], index: 4, kind: input, shape index: {}]   ;;  %s679_s5 = inlined_call_operand.vmem [shape: f32[1,128], index: 5, kind: output, shape index: {}]  }
   0x1   :  { %12 = vsyncpa [#allocation6], 0  ;;  %s27_s20 = sshll.u32 %s675_s1, 4  ;;  %s18_s23 = sshll.u32 %s674_s0, 4  ;;  %s28_s20 = int_to_ptr.vmem [resolvable:$true] %s27_s20  ;;  %s19_s23 = int_to_ptr.vmem [resolvable:$true] %s18_s23 }
   0x2   :  { %s461_s24 = smov [#allocation5]   ;;  %s462_s25 = smov [#allocation3]  }
   0x3   :  { %30 = dma.vmem_to_smem %s28_s20, 16, %s461_s24, [#allocation6]  }
   0x4   :  { %21 = dma.vmem_to_smem %s19_s23, 16, %s462_s25, [#allocation4]  }
   0x5   :  { %s36_s28 = sshll.u32 %s676_s2, 4  ;;  %s463_s29 = smov [#allocation7]   ;;  %s37_s28 = int_to_ptr.vmem [resolvable:$true] %s36_s28 }
   0x6   :  { %39 = dma.vmem_to_smem %s37_s28, 16, %s463_s29, [#allocation6]  }
   0x7   :  { %457 = dma.done.wait [#allocation4], 16  }
   0x8   :  { %458 = vsyncadd [#allocation4], 4294967280 }
   0x9   :  { %459 = dma.done.wait [#allocation6], 32  }
   0xa   :  { %460 = vsyncadd [#allocation6], 4294967264 }
   0xb   :  { %56 = sfence }
   0xc   :  { %s62_s1 = sld [smem:[#allocation3]]  ;;  %v512_v0 = vld [vmem:[%s678_s4] sm:$0x1]  ;;  %v517_v1 = vld [vmem:[%s678_s4 + $0x1] sm:$0x1] }
   0xd   :  { %s351_s30 = sld [smem:[#allocation3 + $0x1]]  ;;  %v528_v6 = vld [vmem:[%s678_s4 + $0x2] sm:$0x1]  ;;  %v540_v15 = vld [vmem:[%s678_s4 + $0x3] sm:$0x1] }
   0xe   :  { %s352_s0 = sld [smem:[#allocation3 + $0x2]]  ;;  %v555_v22 = vld [vmem:[%s678_s4 + $0x4] sm:$0x1] }
   0xf   :  { %s503_s6 = sld [smem:[#allocation3 + $0x3]] }
  0x10   :  { %s505_s7 = sld [smem:[#allocation3 + $0x4]] }
  0x11   :  { %s507_s8 = sld [smem:[#allocation5]] }
  0x12   :  { %s355_s9 = sld [smem:[#allocation3 + $0x5]]  ;;  %v63_v2 = vstv %s62_s1 }
  0x13   :  { %v66_v3 = vstv %s351_s30  ;;  %s356_s13 = sld [smem:[#allocation3 + $0x6]]  ;;  %v64_v4 = vmul.f32 %v63_v2, %v512_v0 }
  0x14   :  { %s357_s14 = sld [smem:[#allocation3 + $0x7]]  ;;  %v67_v5 = vmul.f32 %v66_v3, %v517_v1  ;;  %v70_v7 = vstv %s352_s0 }
  0x15   :  { %s519_s15 = sld [smem:[#allocation3 + $0x8]]  ;;  %v71_v12 = vmul.f32 %v70_v7, %v528_v6  ;;  %v74_v16 = vstv %s503_s6 }
  0x16   :  { %s523_s16 = sld [smem:[#allocation7]]  ;;  %v68_v11 = vadd.f32 %v67_v5, %v64_v4  ;;  %v75_v21 = vmul.f32 %v74_v16, %v540_v15  ;;  %v78_v23 = vstv %s505_s7 }
  0x17   :  { %s530_s19 = sld [smem:[#allocation3 + $0x9]]  ;;  %v79_v33 = vmul.f32 %v78_v23, %v555_v22  ;;  %v82_v39 = vstv %s507_s8 }
  0x18   :  { %v90_v8 = vstv %s355_s9  ;;  %s532_s20 = sld [smem:[#allocation5 + $0x1]]  ;;  %v72_v20 = vadd.f32 %v71_v12, %v68_v11 }
  0x19   :  { %v91_v9 = vmul.f32 %v90_v8, %v512_v0  ;;  %v93_v10 = vstv %s356_s13  ;;  %s362_s21 = sld [smem:[#allocation3 + $0xa]] }
  0x1a   :  { %v94_v13 = vmul.f32 %v93_v10, %v517_v1  ;;  %v97_v14 = vstv %s357_s14  ;;  %s363_s22 = sld [smem:[#allocation3 + $0xb]]  ;;  %v76_v32 = vadd.f32 %v75_v21, %v72_v20 }
  0x1b   :  { %v98_v17 = vmul.f32 %v97_v14, %v528_v6  ;;  %s364_s25 = sld [smem:[#allocation3 + $0xc]]  ;;  %v101_v19 = vstv %s519_s15 }
  0x1c   :  { %v95_v18 = vadd.f32 %v94_v13, %v91_v9  ;;  %s545_s26 = sld [smem:[#allocation3 + $0xd]]  ;;  %v102_v25 = vmul.f32 %v101_v19, %v540_v15  ;;  %v80_v40 = vadd.f32 %v79_v33, %v76_v32  ;;  %v87_v19 = vstv %s523_s16 }
  0x1d   :  { %s547_s27 = sld [smem:[#allocation7 + $0x1]]  ;;  %v105_v27 = vstv %s530_s19 }
  0x1e   :  { %s550_s28 = sld [smem:[#allocation3 + $0xe]]  ;;  %v99_v24 = vadd.f32 %v98_v17, %v95_v18  ;;  %v106_v36 = vmul.f32 %v105_v27, %v555_v22  ;;  %v109_v48 = vstv %s532_s20  ;;  %v83_v53 = vadd.f32 %v82_v39, %v80_v40 }
  0x1f   :  { %v118_v26 = vstv %s362_s21  ;;  %s559_s30 = sld [smem:[#allocation5 + $0x2]] }
  0x20   :  { %v119_v28 = vmul.f32 %v118_v26, %v512_v0  ;;  %v121_v29 = vstv %s363_s22  ;;  %s369_s0 = sld [smem:[#allocation3 + $0xf]]  ;;  %v103_v35 = vadd.f32 %v102_v25, %v99_v24  ;;  %v84_v62 = vmul.f32 0.5, %v83_v53 }
  0x21   :  { %v122_v30 = vmul.f32 %v121_v29, %v517_v1  ;;  %v125_v31 = vstv %s364_s25  ;;  %s370_s6 = sld [smem:[#allocation3 + $0x10]] }
  0x22   :  { %v126_v34 = vmul.f32 %v125_v31, %v528_v6  ;;  %s371_s4 = sld [smem:[#allocation3 + $0x11]]  ;;  %v129_v38 = vstv %s545_s26  ;;  %v107_v44 = vadd.f32 %v106_v36, %v103_v35  ;;  %v85_v18 = vmax.f32 %v83_v53, %v84_v62 }
  0x23   :  { %v123_v37 = vadd.f32 %v122_v30, %v119_v28  ;;  %s372_s7 = sld [smem:[#allocation3 + $0x12]]  ;;  %v130_v42 = vmul.f32 %v129_v38, %v540_v15  ;;  %v114_v30 = vstv %s547_s27 }
  0x24   :  { %s568_s9 = sld [smem:[#allocation7 + $0x2]]  ;;  %v133_v45 = vstv %s550_s28  ;;  %v110_v57 = vadd.f32 %v109_v48, %v107_v44  ;;  %v88_v40 = vmul.f32 %v87_v19, %v85_v18 }
  0x25   :  { %s571_s10 = sld [smem:[#allocation3 + $0x13]]  ;;  %v127_v41 = vadd.f32 %v126_v34, %v123_v37  ;;  %v134_v55 = vmul.f32 %v133_v45, %v555_v22  ;;  %v137_v5 = vstv %s559_s30 }
  0x26   :  { %v146_v43 = vstv %s369_s0  ;;  %s574_s2 = sld [smem:[#allocation5 + $0x3]]  ;;  %v111_v4 = vmul.f32 0.5, %v110_v57 }
  0x27   :  { %v147_v46 = vmul.f32 %v146_v43, %v512_v0  ;;  %v149_v47 = vstv %s370_s6  ;;  %s376_s11 = sld [smem:[#allocation3 + $0x14]]  ;;  %v131_v54 = vadd.f32 %v130_v42, %v127_v41 }
  0x28   :  { %v150_v49 = vmul.f32 %v149_v47, %v517_v1  ;;  %v153_v50 = vstv %s371_s4  ;;  %s377_s8 = sld [smem:[#allocation3 + $0x15]]  ;;  %v112_v21 = vmax.f32 %v110_v57, %v111_v4 }
  0x29   :  { %v154_v51 = vmul.f32 %v153_v50, %v528_v6  ;;  %v157_v52 = vstv %s372_s7  ;;  %s378_s12 = sld [smem:[#allocation3 + $0x16]]  ;;  %v135_v63 = vadd.f32 %v134_v55, %v131_v54 }
  0x2a   :  { %v151_v56 = vadd.f32 %v150_v49, %v147_v46  ;;  %s379_s13 = sld [smem:[#allocation3 + $0x17]]  ;;  %v158_v59 = vmul.f32 %v157_v52, %v540_v15  ;;  %v115_v41 = vmul.f32 %v114_v30, %v112_v21  ;;  %v142_v47 = vstv %s568_s9 }
  0x2b   :  { %s582_s14 = sld [smem:[#allocation3 + $0x18]]  ;;  %v161_v60 = vstv %s571_s10  ;;  %v138_v16 = vadd.f32 %v137_v5, %v135_v63 }
  0x2c   :  { %v155_v58 = vadd.f32 %v154_v51, %v151_v56  ;;  %s585_s15 = sld [smem:[#allocation7 + $0x3]]  ;;  %v162_v10 = vmul.f32 %v161_v60, %v555_v22  ;;  %v165_v24 = vstv %s574_s2  ;;  %v116_v53 = vadd.f32 %v115_v41, %v88_v40 }
  0x2d   :  { %v174_v61 = vstv %s376_s11  ;;  %s588_s17 = sld [smem:[#allocation5 + $0x4]]  ;;  %v139_v31 = vmul.f32 0.5, %v138_v16 }
  0x2e   :  { %v175_v2 = vmul.f32 %v174_v61, %v512_v0  ;;  %v177_v3 = vstv %s377_s8  ;;  %s383_s18 = sld [smem:[#allocation3 + $0x19]]  ;;  %v159_v9 = vadd.f32 %v158_v59, %v155_v58 }
  0x2f   :  { %v178_v7 = vmul.f32 %v177_v3, %v517_v1  ;;  %v181_v8 = vstv %s378_s12  ;;  %s384_s19 = sld [smem:[#allocation3 + $0x1a]]  ;;  %v140_v43 = vmax.f32 %v138_v16, %v139_v31 }
  0x30   :  { %v182_v11 = vmul.f32 %v181_v8, %v528_v6  ;;  %v185_v12 = vstv %s379_s13  ;;  %s385_s20 = sld [smem:[#allocation3 + $0x1b]]  ;;  %v163_v23 = vadd.f32 %v162_v10, %v159_v9 }
  0x31   :  { %v179_v13 = vadd.f32 %v178_v7, %v175_v2  ;;  %v186_v14 = vmul.f32 %v185_v12, %v540_v15  ;;  %s386_s21 = sld [smem:[#allocation3 + $0x1c]]  ;;  %v189_v17 = vstv %s582_s14  ;;  %v143_v57 = vmul.f32 %v142_v47, %v140_v43 }
  0x32   :  { %s597_s22 = sld [smem:[#allocation3 + $0x1d]]  ;;  %v190_v27 = vmul.f32 %v189_v17, %v555_v22  ;;  %v166_v36 = vadd.f32 %v165_v24, %v163_v23  ;;  %v170_v4 = vstv %s585_s15 }
  0x33   :  { %v183_v20 = vadd.f32 %v182_v11, %v179_v13  ;;  %s600_s23 = sld [smem:[#allocation7 + $0x4]]  ;;  %v193_v44 = vstv %s588_s17  ;;  %v144_v9 = vadd.f32 %v143_v57, %v116_v53 }
  0x34   :  { %v202_v25 = vstv %s383_s18  ;;  %s603_s24 = sld [smem:[#allocation5 + $0x5]]  ;;  %v167_v49 = vmul.f32 0.5, %v166_v36 }
  0x35   :  { %v187_v26 = vadd.f32 %v186_v14, %v183_v20  ;;  %v203_v28 = vmul.f32 %v202_v25, %v512_v0  ;;  %v205_v29 = vstv %s384_s19  ;;  %s390_s25 = sld [smem:[#allocation3 + $0x1e]] }
  0x36   :  { %v206_v32 = vmul.f32 %v205_v29, %v517_v1  ;;  %v209_v33 = vstv %s385_s20  ;;  %s391_s16 = sld [smem:[#allocation3 + $0x1f]]  ;;  %v168_v3 = vmax.f32 %v166_v36, %v167_v49 }
  0x37   :  { %v210_v34 = vmul.f32 %v209_v33, %v528_v6  ;;  %v213_v35 = vstv %s386_s21  ;;  %s392_s26 = sld [smem:[#allocation3 + $0x20]]  ;;  %v191_v42 = vadd.f32 %v190_v27, %v187_v26 }
  0x38   :  { %v207_v37 = vadd.f32 %v206_v32, %v203_v28  ;;  %v214_v38 = vmul.f32 %v213_v35, %v540_v15  ;;  %v217_v39 = vstv %s597_s22  ;;  %s393_s28 = sld [smem:[#allocation3 + $0x21]]  ;;  %v171_v17 = vmul.f32 %v170_v4, %v168_v3 }
  0x39   :  { %s612_s27 = sld [smem:[#allocation3 + $0x22]]  ;;  %v218_v46 = vmul.f32 %v217_v39, %v555_v22  ;;  %v194_v54 = vadd.f32 %v193_v44, %v191_v42  ;;  %v198_v12 = vstv %s600_s23 }
  0x3a   :  { %v211_v45 = vadd.f32 %v210_v34, %v207_v37  ;;  %s616_s29 = sld [smem:[#allocation7 + $0x5]]  ;;  %v221_v61 = vstv %s603_s24  ;;  %v172_v33 = vadd.f32 %v171_v17, %v144_v9 }
  0x3b   :  { %v230_v48 = vstv %s390_s25  ;;  %s619_s1 = sld [smem:[#allocation5 + $0x6]]  ;;  %v195_v5 = vmul.f32 0.5, %v194_v54 }
  0x3c   :  { %v215_v50 = vadd.f32 %v214_v38, %v211_v45  ;;  %v231_v51 = vmul.f32 %v230_v48, %v512_v0  ;;  %v233_v52 = vstv %s391_s16  ;;  %s397_s30 = sld [smem:[#allocation3 + $0x23]] }
  0x3d   :  { %v234_v55 = vmul.f32 %v233_v52, %v517_v1  ;;  %v237_v56 = vstv %s392_s26  ;;  %s398_s0 = sld [smem:[#allocation3 + $0x24]]  ;;  %v196_v21 = vmax.f32 %v194_v54, %v195_v5 }
  0x3e   :  { %v219_v58 = vadd.f32 %v218_v46, %v215_v50  ;;  %v238_v59 = vmul.f32 %v237_v56, %v528_v6  ;;  %v241_v60 = vstv %s393_s28  ;;  %s399_s6 = sld [smem:[#allocation3 + $0x25]] }
  0x3f   :  { %v235_v62 = vadd.f32 %v234_v55, %v231_v51  ;;  %v242_v63 = vmul.f32 %v241_v60, %v540_v15  ;;  %v245_v2 = vstv %s612_s27  ;;  %s400_s4 = sld [smem:[#allocation3 + $0x26]]  ;;  %v199_v34 = vmul.f32 %v198_v12, %v196_v21 }
  0x40   :  { %s627_s7 = sld [smem:[#allocation3 + $0x27]]  ;;  %v246_v8 = vmul.f32 %v245_v2, %v555_v22  ;;  %v222_v10 = vadd.f32 %v221_v61, %v219_v58  ;;  %v226_v35 = vstv %s616_s29 }
  0x41   :  { %v239_v7 = vadd.f32 %v238_v59, %v235_v62  ;;  %s631_s9 = sld [smem:[#allocation7 + $0x6]]  ;;  %v249_v18 = vstv %s619_s1  ;;  %v200_v51 = vadd.f32 %v199_v34, %v172_v33 }
  0x42   :  { %v258_v11 = vstv %s397_s30  ;;  %s633_s10 = sld [smem:[#allocation5 + $0x7]]  ;;  %v223_v26 = vmul.f32 0.5, %v222_v10 }
  0x43   :  { %v243_v13 = vadd.f32 %v242_v63, %v239_v7  ;;  %v259_v14 = vmul.f32 %v258_v11, %v512_v0  ;;  %v261_v16 = vstv %s398_s0  ;;  %s404_s2 = sld [smem:[#allocation3 + $0x28]] }
  0x44   :  { %v262_v19 = vmul.f32 %v261_v16, %v517_v1  ;;  %v265_v20 = vstv %s399_s6  ;;  %s405_s11 = sld [smem:[#allocation3 + $0x29]]  ;;  %v224_v37 = vmax.f32 %v222_v10, %v223_v26 }
  0x45   :  { %v247_v23 = vadd.f32 %v246_v8, %v243_v13  ;;  %v266_v24 = vmul.f32 %v265_v20, %v528_v6  ;;  %v269_v25 = vstv %s400_s4  ;;  %s406_s8 = sld [smem:[#allocation3 + $0x2a]] }
  0x46   :  { %v263_v27 = vadd.f32 %v262_v19, %v259_v14  ;;  %v270_v28 = vmul.f32 %v269_v25, %v540_v15  ;;  %v273_v29 = vstv %s627_s7  ;;  %s407_s12 = sld [smem:[#allocation3 + $0x2b]]  ;;  %v227_v52 = vmul.f32 %v226_v35, %v224_v37 }
  0x47   :  { %v250_v30 = vadd.f32 %v249_v18, %v247_v23  ;;  %s642_s13 = sld [smem:[#allocation3 + $0x2c]]  ;;  %v274_v32 = vmul.f32 %v273_v29, %v555_v22  ;;  %v254_v57 = vstv %s631_s9 }
  0x48   :  { %v267_v31 = vadd.f32 %v266_v24, %v263_v27  ;;  %s645_s14 = sld [smem:[#allocation7 + $0x7]]  ;;  %v277_v42 = vstv %s633_s10  ;;  %v228_v63 = vadd.f32 %v227_v52, %v200_v51 }
  0x49   :  { %v286_v36 = vstv %s404_s2  ;;  %s648_s15 = sld [smem:[#allocation5 + $0x8]]  ;;  %v251_v41 = vmul.f32 0.5, %v250_v30 }
  0x4a   :  { %v271_v38 = vadd.f32 %v270_v28, %v267_v31  ;;  %v287_v39 = vmul.f32 %v286_v36, %v512_v0  ;;  %v289_v40 = vstv %s405_s11  ;;  %s411_s17 = sld [smem:[#allocation3 + $0x2d]] }
  0x4b   :  { %v290_v43 = vmul.f32 %v289_v40, %v517_v1  ;;  %v293_v44 = vstv %s406_s8  ;;  %s412_s18 = sld [smem:[#allocation3 + $0x2e]]  ;;  %v252_v54 = vmax.f32 %v250_v30, %v251_v41 }
  0x4c   :  { %v275_v45 = vadd.f32 %v274_v32, %v271_v38  ;;  %v294_v46 = vmul.f32 %v293_v44, %v528_v6  ;;  %v297_v47 = vstv %s407_s12  ;;  %s413_s19 = sld [smem:[#allocation3 + $0x2f]] }
  0x4d   :  { %v291_v48 = vadd.f32 %v290_v43, %v287_v39  ;;  %v298_v49 = vmul.f32 %v297_v47, %v540_v15  ;;  %v301_v50 = vstv %s642_s13  ;;  %s414_s20 = sld [smem:[#allocation3 + $0x30]]  ;;  %v255_v5 = vmul.f32 %v254_v57, %v252_v54 }
  0x4e   :  { %v278_v53 = vadd.f32 %v277_v42, %v275_v45  ;;  %s415_s21 = sld [smem:[#allocation3 + $0x31]]  ;;  %v302_v56 = vmul.f32 %v301_v50, %v555_v22  ;;  %v282_v14 = vstv %s645_s14 }
  0x4f   :  { %v295_v55 = vadd.f32 %v294_v46, %v291_v48  ;;  %s658_s22 = sld [smem:[#allocation7 + $0x8]]  ;;  %v305_v2 = vstv %s648_s15 }
  0x50   :  { %v279_v58 = vmul.f32 0.5, %v278_v53  ;;  %v314_v59 = vstv %s411_s17  ;;  %s416_s23 = sld [smem:[#allocation5 + $0x9]] }
  0x51   :  { %v299_v60 = vadd.f32 %v298_v49, %v295_v55  ;;  %v315_v61 = vmul.f32 %v314_v59, %v512_v0  ;;  %v317_v62 = vstv %s412_s18  ;;  %s417_s24 = sld [smem:[#allocation7 + $0x9]] }
  0x52   :  { %v318_v3 = vmul.f32 %v317_v62, %v517_v1  ;;  %v321_v4 = vstv %s413_s19  ;;  %v280_v10 = vmax.f32 %v278_v53, %v279_v58  ;;  %v256_v1 = vadd.f32 %v255_v5, %v228_v63 }
  0x53   :  { %v303_v7 = vadd.f32 %v302_v56, %v299_v60  ;;  %v322_v8 = vmul.f32 %v321_v4, %v528_v6  ;;  %v325_v9 = vstv %s414_s20 }
  0x54   :  { %v319_v11 = vadd.f32 %v318_v3, %v315_v61  ;;  %v326_v12 = vmul.f32 %v325_v9, %v540_v15  ;;  %v329_v13 = vstv %s415_s21  ;;  %v283_v19 = vmul.f32 %v282_v14, %v280_v10 }
  0x55   :  { %v306_v0 = vadd.f32 %v305_v2, %v303_v7  ;;  %v330_v17 = vmul.f32 %v329_v13, %v555_v22  ;;  %v310_v23 = vstv %s658_s22  ;;  %v342_v22 = vstv %s677_s3 }
  0x56   :  { %v323_v16 = vadd.f32 %v322_v8, %v319_v11  ;;  %v333_v6 = vstv %s416_s23  ;;  %v284_v25 = vadd.f32 %v283_v19, %v256_v1 }
  0x57   :  { %v307_v18 = vmul.f32 0.5, %v306_v0  ;;  %v338_v15 = vstv %s417_s24 }
  0x58   :  { %v327_v20 = vadd.f32 %v326_v12, %v323_v16 }
  0x59   :  { %v308_v21 = vmax.f32 %v306_v0, %v307_v18 }
  0x5a   :  { %v331_v24 = vadd.f32 %v330_v17, %v327_v20 }
  0x5b   :  { %v311_v26 = vmul.f32 %v310_v23, %v308_v21 }
  0x5c   :  { %v334_v27 = vadd.f32 %v333_v6, %v331_v24 }
  0x5d   :  { %v312_v29 = vadd.f32 %v311_v26, %v284_v25 }
  0x5e   :  { %v335_v28 = vmul.f32 0.5, %v334_v27 }
  0x60   :  { %v336_v30 = vmax.f32 %v334_v27, %v335_v28 }
  0x62   :  { %v339_v31 = vmul.f32 %v338_v15, %v336_v30 }
  0x64   :  { %v340_v32 = vadd.f32 %v339_v31, %v312_v29 }
  0x66   :  { %v343_v33 = vadd.f32 %v342_v22, %v340_v32 }
  0x68   :  { %344 = vst [vmem:[%s679_s5] sm:$0x1] %v343_v33 }
  0x69   :  { %349 = vsyncpa [#allocation4], 1 }
  0x6a   :  { %350 = vsyncpa [#allocation6], 1 }

</bundles_post_ra>
